<compile_context>
chip_gen: v7x
topology: tpu7x:2x2x1
jax: 0.10.0
libtpu: 0.0.40
codegen_flags: <defaults>
</compile_context>

<pallas_src>
import functools
import math

import jax
import jax.numpy as jnp
from jax import lax
from jax.experimental import pallas as pl
from jax.experimental.pallas import tpu as pltpu


def _round_up(x, m):
    return ((x + m - 1) // m) * m


# ----------------------------------------------------------------------------
# Pallas kernel 1: fused matmul + bias (lane-dense, bf16 MXU inputs, f32 acc)
# ----------------------------------------------------------------------------
def _linear_kernel(x_ref, w_ref, b_ref, o_ref):
    acc = jnp.dot(x_ref[...], w_ref[...], preferred_element_type=jnp.float32)
    o_ref[...] = (acc + b_ref[...]).astype(o_ref.dtype)


def pallas_linear(x, w, b, *, tm_max=512):
    """y = x @ w + b.  x:(M,K) f32, w:(K,N) f32, b:(N,) f32 -> (M,N) f32.

    - N is padded internally to a multiple of 128 so output stores are lane-dense
      (padded columns carry bias 0 and are sliced off before returning).
    - x / w are cast to bf16 at the kernel boundary (native MXU input format on
      v5e/v6e/v7x); accumulation and the bias/epilogue stay in f32.
    - Row tile: round M up only to 8 when M is small (avoids a full HBM pad copy),
      cap at 512 rows (fills the 256x256 MXUs on v6e/v7x, still well inside the
      16 MiB scoped-VMEM default on v5e for K,N up to ~1K in bf16).
    """
    M, K = x.shape
    K2, N = w.shape
    assert K == K2
    Np = _round_up(N, 128)
    if Np != N:
        w = jnp.pad(w, ((0, 0), (0, Np - N)))
        b = jnp.pad(b, ((0, Np - N),))

    tm = min(tm_max, _round_up(M, 8))
    Mp = _round_up(M, tm)
    if Mp != M:
        x = jnp.pad(x, ((0, Mp - M), (0, 0)))

    x_bf = x.astype(jnp.bfloat16)
    w_bf = w.astype(jnp.bfloat16)

    out = pl.pallas_call(
        _linear_kernel,
        out_shape=jax.ShapeDtypeStruct((Mp, Np), jnp.float32),
        grid=(Mp // tm,),
        in_specs=[
            pl.BlockSpec((tm, K), lambda i: (i, 0)),
            pl.BlockSpec((K, Np), lambda i: (0, 0)),
            pl.BlockSpec((1, Np), lambda i: (0, 0)),
        ],
        out_specs=pl.BlockSpec((tm, Np), lambda i: (i, 0)),
        compiler_params=pltpu.CompilerParams(dimension_semantics=("parallel",)),
    )(x_bf, w_bf, b.reshape(1, Np))
    return out[:M, :N]


# ----------------------------------------------------------------------------
# Pallas kernel 2: per-batch scaled-dot-product attention (full attn matrix out)
# ----------------------------------------------------------------------------
def _attention_kernel(q_ref, k_ref, v_ref, ctx_ref, attn_ref, *, scale):
    q = q_ref[0].astype(jnp.bfloat16)            # (L, Dp)  bf16 MXU inputs
    k = k_ref[0].astype(jnp.bfloat16)            # (L, Dp)
    # scores = q @ k^T / sqrt(d_k)  (f32 accumulation; padded head cols are 0 -> no effect)
    s = lax.dot_general(q, k, (((1,), (1,)), ((), ())),
                        preferred_element_type=jnp.float32) * scale   # (L, L)
    # numerically stable softmax, all in f32
    m = jnp.max(s, axis=-1, keepdims=True)
    e = jnp.exp(s - m)
    p = e / jnp.sum(e, axis=-1, keepdims=True)
    attn_ref[0] = p.astype(attn_ref.dtype)
    # TODO(synk): nn.Dropout(p=0.5) on p_attn is training-only; eval-mode identity here.
    ctx = jnp.dot(p.astype(jnp.bfloat16), v_ref[0].astype(jnp.bfloat16),
                  preferred_element_type=jnp.float32)                  # (L, Dp)
    ctx_ref[0] = ctx.astype(ctx_ref.dtype)


# ----------------------------------------------------------------------------
# SelfAttention forward
# ----------------------------------------------------------------------------
def self_attention_forward(params, x, tags=None, mask=None):
    """x: (B, S, T, in_units) -> (context (B,S,T,out_units), attn (B, S*T, S*T))."""
    if mask is not None:
        # TODO(synk): mask != None path uses data-dependent repeat_interleave over C1-tag
        # counts (variable shapes); not expressible statically — only mask=None implemented.
        raise NotImplementedError("mask != None (C1-tag masking) path not implemented")
    del tags  # unused when mask is None, matching the PyTorch reference

    B, S, T, K = x.shape
    N = params["w_q"].shape[1]
    L = S * T
    Np = _round_up(N, 128)           # lane-dense head dim carried through both kernels
    pad_n = Np - N

    # Fused QKV weight: columns [0:Np)=Q, [Np:2Np)=K, [2Np:3Np)=V, each zero-padded to 128.
    w_qkv = jnp.concatenate(
        [jnp.pad(params["w_q"], ((0, 0), (0, pad_n))),
         jnp.pad(params["w_k"], ((0, 0), (0, pad_n))),
         jnp.pad(params["w_v"], ((0, 0), (0, pad_n)))], axis=1)
    b_qkv = jnp.concatenate(
        [jnp.pad(params["b_q"], (0, pad_n)),
         jnp.pad(params["b_k"], (0, pad_n)),
         jnp.pad(params["b_v"], (0, pad_n))])

    x_flat = x.reshape(B * L, K)
    qkv = pallas_linear(x_flat, w_qkv, b_qkv)                 # (B*L, 3*Np) f32

    q = qkv[:, 0:Np].reshape(B, L, Np)
    k = qkv[:, Np:2 * Np].reshape(B, L, Np)
    v = qkv[:, 2 * Np:3 * Np].reshape(B, S, T, Np)
    # Reference: value = torch.transpose(value, 1, 2).view(B, T*S, d_k)
    v_perm = jnp.transpose(v, (0, 2, 1, 3)).reshape(B, L, Np)

    scale = 1.0 / math.sqrt(N)       # scale uses the real (unpadded) d_k
    ctx_p, attn = pl.pallas_call(
        functools.partial(_attention_kernel, scale=scale),
        out_shape=(jax.ShapeDtypeStruct((B, L, Np), jnp.float32),
                   jax.ShapeDtypeStruct((B, L, L), jnp.float32)),
        grid=(B,),
        in_specs=[
            pl.BlockSpec((1, L, Np), lambda b: (b, 0, 0)),
            pl.BlockSpec((1, L, Np), lambda b: (b, 0, 0)),
            pl.BlockSpec((1, L, Np), lambda b: (b, 0, 0)),
        ],
        out_specs=(
            pl.BlockSpec((1, L, Np), lambda b: (b, 0, 0)),
            pl.BlockSpec((1, L, L), lambda b: (b, 0, 0)),
        ),
        compiler_params=pltpu.CompilerParams(dimension_semantics=("parallel",)),
    )(q, k, v_perm)

    context = ctx_p[:, :, :N].reshape(B, S, T, N)             # drop zero pad columns
    return context, attn


# ----------------------------------------------------------------------------
# Pure-JAX reference (for correctness sanity check)
# ----------------------------------------------------------------------------
def reference_forward(params, x):
    B, S, T, K = x.shape
    q = x @ params["w_q"] + params["b_q"]
    k = x @ params["w_k"] + params["b_k"]
    v = x @ params["w_v"] + params["b_v"]
    d_k = q.shape[-1]
    L = S * T
    qf = q.reshape(B, L, d_k)
    kf = k.reshape(B, L, d_k)
    scores = jnp.einsum("bld,bmd->blm", qf, kf) / math.sqrt(d_k)
    p = jax.nn.softmax(scores, axis=-1)
    vf = jnp.transpose(v, (0, 2, 1, 3)).reshape(B, L, d_k)
    ctx = jnp.einsum("blm,bmd->bld", p, vf).reshape(B, S, T, d_k)
    return ctx, p


# ----------------------------------------------------------------------------
# Parameters
# ----------------------------------------------------------------------------
def make_params(key, in_units, out_units):
    ks = jax.random.split(key, 6)
    s = (1.0 / in_units) ** 0.5
    return dict(
        w_q=jax.random.normal(ks[0], (in_units, out_units), jnp.float32) * s,
        b_q=0.01 * jax.random.normal(ks[1], (out_units,), jnp.float32),
        w_k=jax.random.normal(ks[2], (in_units, out_units), jnp.float32) * s,
        b_k=0.01 * jax.random.normal(ks[3], (out_units,), jnp.float32),
        w_v=jax.random.normal(ks[4], (in_units, out_units), jnp.float32) * s,
        b_v=0.01 * jax.random.normal(ks[5], (out_units,), jnp.float32),
    )


# ----------------------------------------------------------------------------
# Driver
# ----------------------------------------------------------------------------
if __name__ == "__main__":
    key = jax.random.PRNGKey(0)
    kp, kx = jax.random.split(key)

    B, S, T = 2, 4, 8              # batch, sweep_dim, time_dim
    in_units, out_units = 48, 32
    params = make_params(kp, in_units, out_units)
    x = jax.random.normal(kx, (B, S, T, in_units), jnp.float32)
    tags = [["C1", "NC1", "ASSBS_C1", "OTHER"]] * B   # unused when mask is None

    fwd = jax.jit(lambda p, xx: self_attention_forward(p, xx, tags=tags, mask=None))
    context, attn = fwd(params, x)
    context, attn = jax.block_until_ready((context, attn))

    assert context.shape == (B, S, T, out_units), context.shape
    assert attn.shape == (B, S * T, S * T), attn.shape
    assert bool(jnp.all(jnp.isfinite(context))) and bool(jnp.all(jnp.isfinite(attn)))
    assert bool(jnp.allclose(jnp.sum(attn, axis=-1), 1.0, atol=1e-3))

    ref_ctx, ref_attn = reference_forward(params, x)
    assert bool(jnp.allclose(context, ref_ctx, atol=5e-2, rtol=5e-2))
    assert bool(jnp.allclose(attn, ref_attn, atol=5e-2, rtol=5e-2))

    print("KERNEL_OK")
</pallas_src>

<mosaic_0001>
module attributes {stable_mosaic.version = 11 : i64} {
  func.func @_linear_kernel(%arg0: i32, %arg1: memref<64x48xbf16, #tpu.memory_space<vmem>>, %arg2: memref<48x384xbf16, #tpu.memory_space<vmem>>, %arg3: memref<1x384xf32, #tpu.memory_space<vmem>>, %arg4: memref<64x384xf32, #tpu.memory_space<vmem>>) attributes {dimension_semantics = [#tpu.dimension_semantics<parallel>], iteration_bounds = array<i64: 1>, scalar_prefetch = 0 : i64, scratch_operands = 0 : i64, tpu.core_type = #tpu.core_type<tc>, window_params = [{transform_indices = @transform_0, window_bounds = array<i64: 64, 48>}, {pipeline_mode = #tpu.pipeline_mode<synchronous>, transform_indices = @transform_1, window_bounds = array<i64: 48, 384>}, {pipeline_mode = #tpu.pipeline_mode<synchronous>, transform_indices = @transform_2, window_bounds = array<i64: 1, 384>}, {transform_indices = @transform_3, window_bounds = array<i64: 64, 384>}]} {
    %c0 = arith.constant 0 : index
    %c0_0 = arith.constant 0 : index
    %0 = vector.load %arg1[%c0, %c0_0] : memref<64x48xbf16, #tpu.memory_space<vmem>>, vector<64x48xbf16>
    %c0_1 = arith.constant 0 : index
    %c0_2 = arith.constant 0 : index
    %1 = vector.load %arg2[%c0_1, %c0_2] : memref<48x384xbf16, #tpu.memory_space<vmem>>, vector<48x384xbf16>
    %cst = arith.constant dense<0.000000e+00> : vector<64x384xf32>
    %2 = tpu.matmul %0, %1, %cst {dimension_numbers = #tpu.dot_dimension_numbers<[1], [0], [0], [1], [0, 0, 1, 1], [], []>} : vector<64x48xbf16>, vector<48x384xbf16>, vector<64x384xf32> -> vector<64x384xf32>
    %c0_3 = arith.constant 0 : index
    %c0_4 = arith.constant 0 : index
    %3 = vector.load %arg3[%c0_3, %c0_4] : memref<1x384xf32, #tpu.memory_space<vmem>>, vector<1x384xf32>
    %4 = vector.broadcast %3 : vector<1x384xf32> to vector<64x384xf32>
    %5 = arith.addf %2, %4 : vector<64x384xf32>
    %c0_5 = arith.constant 0 : index
    %c0_6 = arith.constant 0 : index
    %6 = vector.load %arg4[%c0_5, %c0_6] : memref<64x384xf32, #tpu.memory_space<vmem>>, vector<64x384xf32>
    tpu.vector_store %arg4[%c0_5, %c0_6], %5 {strides = array<i32>} : memref<64x384xf32, #tpu.memory_space<vmem>>, vector<64x384xf32>,
    return
  }
  func.func @transform_0(%arg0: i32) -> (i32, i32) {
    %c0_i32 = arith.constant 0 : i32
    %c0_i32_0 = arith.constant 0 : i32
    return %arg0, %c0_i32 : i32, i32
  }
  func.func @transform_1(%arg0: i32) -> (i32, i32) {
    %c0_i32 = arith.constant 0 : i32
    %c0_i32_0 = arith.constant 0 : i32
    %c0_i32_1 = arith.constant 0 : i32
    return %c0_i32, %c0_i32_0 : i32, i32
  }
  func.func @transform_2(%arg0: i32) -> (i32, i32) {
    %c0_i32 = arith.constant 0 : i32
    %c0_i32_0 = arith.constant 0 : i32
    %c0_i32_1 = arith.constant 0 : i32
    return %c0_i32, %c0_i32_0 : i32, i32
  }
  func.func @transform_3(%arg0: i32) -> (i32, i32) {
    %c0_i32 = arith.constant 0 : i32
    %c0_i32_0 = arith.constant 0 : i32
    return %arg0, %c0_i32 : i32, i32
  }
}

module attributes {stable_mosaic.version = 11 : i64} {
  func.func @_attention_kernel(%arg0: i32, %arg1: memref<1x32x128xf32, #tpu.memory_space<vmem>>, %arg2: memref<1x32x128xf32, #tpu.memory_space<vmem>>, %arg3: memref<1x32x128xf32, #tpu.memory_space<vmem>>, %arg4: memref<1x32x128xf32, #tpu.memory_space<vmem>>, %arg5: memref<1x32x32xf32, #tpu.memory_space<vmem>>) attributes {dimension_semantics = [#tpu.dimension_semantics<parallel>], iteration_bounds = array<i64: 2>, scalar_prefetch = 0 : i64, scratch_operands = 0 : i64, tpu.core_type = #tpu.core_type<tc>, window_params = [{transform_indices = @transform_0, window_bounds = array<i64: 1, 32, 128>}, {transform_indices = @transform_1, window_bounds = array<i64: 1, 32, 128>}, {transform_indices = @transform_2, window_bounds = array<i64: 1, 32, 128>}, {transform_indices = @transform_3, window_bounds = array<i64: 1, 32, 128>}, {transform_indices = @transform_4, window_bounds = array<i64: 1, 32, 32>}]} {
    %c0 = arith.constant 0 : index
    %c0_0 = arith.constant 0 : index
    %c0_1 = arith.constant 0 : index
    %0 = vector.load %arg1[%c0, %c0_0, %c0_1] : memref<1x32x128xf32, #tpu.memory_space<vmem>>, vector<1x32x128xf32>
    %1 = vector.shape_cast %0 : vector<1x32x128xf32> to vector<32x128xf32>
    %2 = arith.truncf %1 : vector<32x128xf32> to vector<32x128xbf16>
    %c0_2 = arith.constant 0 : index
    %c0_3 = arith.constant 0 : index
    %c0_4 = arith.constant 0 : index
    %3 = vector.load %arg2[%c0_2, %c0_3, %c0_4] : memref<1x32x128xf32, #tpu.memory_space<vmem>>, vector<1x32x128xf32>
    %4 = vector.shape_cast %3 : vector<1x32x128xf32> to vector<32x128xf32>
    %5 = arith.truncf %4 : vector<32x128xf32> to vector<32x128xbf16>
    %cst = arith.constant dense<0.000000e+00> : vector<32x32xf32>
    %6 = tpu.matmul %2, %5, %cst {dimension_numbers = #tpu.dot_dimension_numbers<[1], [1], [0], [0], [0, 0, 1, 0], [], []>} : vector<32x128xbf16>, vector<32x128xbf16>, vector<32x32xf32> -> vector<32x32xf32>
    %cst_5 = arith.constant 0.176776692 : f32
    %7 = vector.broadcast %cst_5 : f32 to vector<32x32xf32>
    %8 = arith.mulf %6, %7 : vector<32x32xf32>
    %cst_6 = arith.constant dense<0xFF800000> : vector<32xf32>
    %9 = vector.multi_reduction <maximumf>, %8, %cst_6 [1] : vector<32x32xf32> to vector<32xf32>
    %10 = vector.shape_cast %9 : vector<32xf32> to vector<32x1xf32>
    %11 = vector.broadcast %10 : vector<32x1xf32> to vector<32x32xf32>
    %12 = arith.subf %8, %11 : vector<32x32xf32>
    %13 = math.exp %12 : vector<32x32xf32>
    %cst_7 = arith.constant dense<0.000000e+00> : vector<32xf32>
    %14 = vector.multi_reduction <add>, %13, %cst_7 [1] : vector<32x32xf32> to vector<32xf32>
    %15 = vector.shape_cast %14 : vector<32xf32> to vector<32x1xf32>
    %16 = vector.broadcast %15 : vector<32x1xf32> to vector<32x32xf32>
    %17 = arith.divf %13, %16 : vector<32x32xf32>
    %c0_8 = arith.constant 0 : index
    %c0_9 = arith.constant 0 : index
    %c0_10 = arith.constant 0 : index
    %18 = vector.load %arg5[%c0_8, %c0_9, %c0_10] : memref<1x32x32xf32, #tpu.memory_space<vmem>>, vector<1x32x32xf32>
    %19 = vector.shape_cast %18 : vector<1x32x32xf32> to vector<32x32xf32>
    %20 = vector.shape_cast %17 : vector<32x32xf32> to vector<1x32x32xf32>
    tpu.vector_store %arg5[%c0_8, %c0_9, %c0_10], %20 {strides = array<i32>} : memref<1x32x32xf32, #tpu.memory_space<vmem>>, vector<1x32x32xf32>,
    %21 = arith.truncf %17 : vector<32x32xf32> to vector<32x32xbf16>
    %c0_11 = arith.constant 0 : index
    %c0_12 = arith.constant 0 : index
    %c0_13 = arith.constant 0 : index
    %22 = vector.load %arg3[%c0_11, %c0_12, %c0_13] : memref<1x32x128xf32, #tpu.memory_space<vmem>>, vector<1x32x128xf32>
    %23 = vector.shape_cast %22 : vector<1x32x128xf32> to vector<32x128xf32>
    %24 = arith.truncf %23 : vector<32x128xf32> to vector<32x128xbf16>
    %cst_14 = arith.constant dense<0.000000e+00> : vector<32x128xf32>
    %25 = tpu.matmul %21, %24, %cst_14 {dimension_numbers = #tpu.dot_dimension_numbers<[1], [0], [0], [1], [0, 0, 1, 1], [], []>} : vector<32x32xbf16>, vector<32x128xbf16>, vector<32x128xf32> -> vector<32x128xf32>
    %c0_15 = arith.constant 0 : index
    %c0_16 = arith.constant 0 : index
    %c0_17 = arith.constant 0 : index
    %26 = vector.load %arg4[%c0_15, %c0_16, %c0_17] : memref<1x32x128xf32, #tpu.memory_space<vmem>>, vector<1x32x128xf32>
    %27 = vector.shape_cast %26 : vector<1x32x128xf32> to vector<32x128xf32>
    %28 = vector.shape_cast %25 : vector<32x128xf32> to vector<1x32x128xf32>
    tpu.vector_store %arg4[%c0_15, %c0_16, %c0_17], %28 {strides = array<i32>} : memref<1x32x128xf32, #tpu.memory_space<vmem>>, vector<1x32x128xf32>,
    return
  }
  func.func @transform_0(%arg0: i32) -> (i32, i32, i32) {
    %c0_i32 = arith.constant 0 : i32
    %c0_i32_0 = arith.constant 0 : i32
    %c0_i32_1 = arith.constant 0 : i32
    return %arg0, %c0_i32, %c0_i32_0 : i32, i32, i32
  }
  func.func @transform_1(%arg0: i32) -> (i32, i32, i32) {
    %c0_i32 = arith.constant 0 : i32
    %c0_i32_0 = arith.constant 0 : i32
    %c0_i32_1 = arith.constant 0 : i32
    return %arg0, %c0_i32, %c0_i32_0 : i32, i32, i32
  }
  func.func @transform_2(%arg0: i32) -> (i32, i32, i32) {
    %c0_i32 = arith.constant 0 : i32
    %c0_i32_0 = arith.constant 0 : i32
    %c0_i32_1 = arith.constant 0 : i32
    return %arg0, %c0_i32, %c0_i32_0 : i32, i32, i32
  }
  func.func @transform_3(%arg0: i32) -> (i32, i32, i32) {
    %c0_i32 = arith.constant 0 : i32
    %c0_i32_0 = arith.constant 0 : i32
    %c0_i32_1 = arith.constant 0 : i32
    return %arg0, %c0_i32, %c0_i32_0 : i32, i32, i32
  }
  func.func @transform_4(%arg0: i32) -> (i32, i32, i32) {
    %c0_i32 = arith.constant 0 : i32
    %c0_i32_0 = arith.constant 0 : i32
    %c0_i32_1 = arith.constant 0 : i32
    return %arg0, %c0_i32, %c0_i32_0 : i32, i32, i32
  }
}

</mosaic_0001>

<bundles_post_ra>
// kernel: _lambda_.3
= control target key start
LH: loop header
LB: loop body
LE: loop exit
PB: predicated region body
PF: predicated region fallthrough
CT: control target
= control target key end

     0   :  { %10 = vsyncpa [#allocation3], 0  ;;  %s894_s0 = inlined_call_operand.vmem [shape: f32[2,32,128], index: 0, kind: input, shape index: {}]   ;;  %s895_s1 = inlined_call_operand.vmem [shape: f32[2,32,128], index: 1, kind: input, shape index: {}]   ;;  %s896_s2 = inlined_call_operand.vmem [shape: f32[2,32,128], index: 2, kind: input, shape index: {}]   ;;  %s897_s3 = inlined_call_operand.vmem [shape: f32[2,32,128], index: 3, kind: output, shape index: {0}]   ;;  %s898_s4 = inlined_call_operand.hbm [shape: f32[2,32,32], index: 4, kind: output, shape index: {1}]  }
   0x1   :  { %12 = vsyncpa [#allocation3 + $0x1], 0  ;;  %s762_s15 = smov 0   ;;  %s764_s16 = smov 0  }
   0x2   :  { %s766_s17 = smov 0   ;;  %s768_s18 = smov 0  }
   0x3 LB: > { %s783_s19 = sadd.s32 4294967295, %s732_s18   ;;  %s564_s20 = sadd.s32 4294967294, %s732_s18   ;;  %s732_s18 = sphi %s768_s18, %s904_s18   ;;  %s728_s17 = sphi %s766_s17, %s903_s17   ;;  %s724_s16 = sphi %s764_s16, %s902_s16   ;;  %s720_s15 = sphi %s762_s15, %s901_s15  }
   0x4   : > { %s787_s21 = sadd.s32 1, %s732_s18   ;;  %s129_s22 = sadd.s32 1, %s728_s17 }
   0x5   : > { %s126_s23 = ssub.s32 %s732_s18, %s787_s21  ;;  %p139_p0 = scmp.ne.s32.totalorder %s728_s17, %s724_s16 }
   0x6   : > { %p127_p1 = scmp.eq.s32.totalorder %s126_s23, 0  ;;  %p140_p2 = scmp.eq.s32.totalorder %s783_s19, 1 }
   0x7   : > { %p145_p3 = scmp.ne.s32.totalorder %s724_s16, %s720_s15  ;;  %p146_p4 = scmp.eq.s32.totalorder %s564_s20, 1 }
   0x8   : > { %s798_s24 = scalar_select %p127_p1, %s728_s17, %s129_s22  }
   0x9   : > { %p800_p5 = por %p140_p2, %p139_p0  ;;  %p804_p6 = por %p146_p4, %p145_p3 }
   0xa   : > { %p567_p7 = scmp.ge.s32.totalorder %s732_s18, 1  ;;  %p188_p8 = scmp.lt.s32.totalorder %s732_s18, 3 }
   0xc   : > { %p189_p9 = pnand %p567_p7, %p188_p8 }
   0xd   : > { %p229_p10 = scmp.lt.s32.totalorder (!%p189_p9), %s783_s19, 1  ;;  %vm315_vm0 = vcmask (!%p189_p9), 261120   ;;  %s226_s12 = sand.u32 (!%p189_p9), 1, %s724_s16  }
   0xe   : > { %192 = sbr.rel (%p189_p9) target bundleno = 799 (0x31f), region = 32  ;;  %s568_s13 = sshll.u32 (!%p189_p9), %s226_s12, 5 }
   0xf   : > { %s228_s14 = scalar_lea.vmem (!%p189_p9), [#allocation2], %s568_s13  ;;  %s588_s20 = sshll.u32 (!%p189_p9), %s783_s19, 9 }
  0x10   : > { %s453_s22 = sshll.u32 (!%p189_p9), %s228_s14, 4  ;;  %s845_s29 = scalar_lea.hbm (!%p189_p9), %s898_s4, %s588_s20  ;;  %s847_s22 = int_to_ptr.vmem [resolvable:$true] %s453_s22 }
  0x11   : > { %s849_s30 = scalar_lea.sflag (!%p189_p9), [#allocation3], %s226_s12  ;;  %s734_s6 = smov (!%p189_p9), [#allocation2]  }
  0x15   : > { %s230_s27 = scalar_select %p229_p10, %s783_s19, 1 }
  0x16   : > { %s674_s19 = sshll.u32 %s734_s6, 4  ;;  %s675_s19 = int_to_ptr.vmem [resolvable:$false] %s674_s19 }
  0x17   : > { %s812_s28 = sshll.u32 %s230_s27, 5  ;;  %s676_s7 = scalar_lea.vmem %s675_s19, 1024 }
  0x18   : > { %s238_s5 = scalar_lea.vmem %s895_s1, %s812_s28  ;;  %s233_s8 = scalar_lea.vmem %s894_s0, %s812_s28 }
  0x19   : > { %v256_v0 = vld [vmem:[%s238_s5] sm:$0xff]  ;;  %v257_v1 = vld [vmem:[%s238_s5 + $0x8] sm:$0xff]  ;;  %v258_v2 = vld [vmem:[%s238_s5 + $0x10] sm:$0xff]  ;;  %s243_s11 = scalar_lea.vmem %s896_s2, %s812_s28  ;;  %p677_p0 = scmp.lt.s32.totalorder %s847_s22, %s675_s19 }
  0x1a   : > { %v260_v3 = vpack.c.bf16 %v257_v1, %v256_v0  ;;  %v259_v4 = vld [vmem:[%s238_s5 + $0x18] sm:$0xff]  ;;  %v250_v5 = vld [vmem:[%s233_s8] sm:$0xff]  ;;  %v251_v6 = vld [vmem:[%s233_s8 + $0x8] sm:$0xff]  ;;  %s670_s5 = scalar_lea.vmem %s847_s22, 512 }
  0x1b   : > { %v261_v7 = vpack.c.bf16 %v259_v4, %v258_v2  ;;  %v254_v8 = vpack.c.bf16 %v251_v6, %v250_v5  ;;  %v252_v9 = vld [vmem:[%s233_s8 + $0x10] sm:$0xff]  ;;  %v253_v10 = vld [vmem:[%s233_s8 + $0x18] sm:$0xff]  ;;  %v366_v44 = vld [vmem:[%s243_s11] sm:$0xff]  ;;  %p671_p11 = scmp.ne.s32.totalorder %s847_s22, %s670_s5  ;;  %p678_p1 = scmp.lt.s32.totalorder %s676_s7, %s670_s5 }
  0x1c   : > { %597 = vmatprep.subr.bf16.mxu0 %v260_v3  ;;  %v255_v11 = vpack.c.bf16 %v253_v10, %v252_v9  ;;  %v367_v45 = vld [vmem:[%s243_s11 + $0x8] sm:$0xff]  ;;  %v368_v46 = vld [vmem:[%s243_s11 + $0x10] sm:$0xff]  ;;  %v369_v48 = vld [vmem:[%s243_s11 + $0x18] sm:$0xff] }
  0x1d   : > { %598 = vmatpush3.bf16.xpose.msra.mxu0 %v260_v3  ;;  %601 = vmatprep.mubr.bf16.mxu0 %v254_v8  ;;  %v370_v47 = vpack.c.bf16 %v367_v45, %v366_v44  ;;  %v371_v49 = vpack.c.bf16 %v369_v48, %v368_v46  ;;  %p672_p12 = pnand %p671_p11, %p800_p5  ;;  %p679_p2 = por %p678_p1, %p677_p0 }
  0x1e   : > { %599 = vmatprep.subr.bf16.mxu0 %v261_v7 }
  0x1f   : > { %605 = vmatprep.subr.bf16.mxu1 %v370_v47  ;;  %p673_p13 = pneg %p672_p12 }
  0x20   : > { %606 = vmatpush3.bf16.msra.mxu1 %v370_v47 }
  0x21   : > { %607 = vmatprep.subr.bf16.mxu1 %v371_v49  ;;  %p680_p3 = pnand %p679_p2, %p673_p13 }
  0x24   : > { %608 = vmatpush3.bf16.msra.mxu1 %v371_v49 }
  0x25   : > { %600 = vmatpush3.bf16.xpose.msra.mxu0 %v261_v7 }
  0x2c   : > { %602 = vmatmul.mubr.bf16.vlgmr.msra.gmra.mrb[0].mxu0 %v255_v11 }
  0xff   : > { %v603_v12 = vpop.f32.mrb[0].mxu0 }
 0x100   : > { %v313_v13 = vmul.f32 0.17677669, %v603_v12  ;;  %v296_v14 = vpop.f32.mrb[1].mxu0 }
 0x101   : > { %v311_v15 = vmul.f32 0.17677669, %v296_v14  ;;  %v604_v16 = vpop.f32.mrb[2].mxu0 }
 0x102   : > { %v314_v17 = vmul.f32 0.17677669, %v604_v16  ;;  %v299_v18 = vpop.f32.mrb[3].mxu0  ;;  %v322_v19 = vsel %vm315_vm0, %v313_v13, -inf }
 0x103   : > { %v312_v20 = vmul.f32 0.17677669, %v299_v18  ;;  %323 = vmax.xlane.f32.xlu1 %v322_v19  ;;  %v316_v21 = vsel %vm315_vm0, %v311_v15, -inf }
 0x104   : > { %317 = vmax.xlane.f32.xlu0 %v316_v21  ;;  %v325_v22 = vsel %vm315_vm0, %v314_v17, -inf }
 0x105   : > { %v319_v23 = vsel %vm315_vm0, %v312_v20, -inf }
 0x107   : > { %326 = vmax.xlane.f32.xlu1 %v325_v22 }
 0x108   : > { %320 = vmax.xlane.f32.xlu0 %v319_v23 }
 0x190   : > { %v324_v24 = vpop.xlane.xlu1 %323 }
 0x191   : > { %v330_v25 = vsub.f32 %v313_v13, %v324_v24  ;;  %v318_v26 = vpop.xlane.xlu0 %317 }
 0x192   : > { %v328_v27 = vsub.f32 %v311_v15, %v318_v26 }
 0x193   : > { %v336_v28 = vmul.f32 1.442695, %v330_v25 }
 0x194   : > { %v332_v29 = vmul.f32 1.442695, %v328_v27  ;;  %v327_v30 = vpop.xlane.xlu1 %326 }
 0x195   : > { %v331_v31 = vsub.f32 %v314_v17, %v327_v30  ;;  %v321_v32 = vpop.xlane.xlu0 %320 }
 0x196   : > { %654 = vpow2.f32 %v332_v29  ;;  %v329_v33 = vsub.f32 %v312_v20, %v321_v32 }
 0x197   : > { %656 = vpow2.f32 %v336_v28  ;;  %v338_v34 = vmul.f32 1.442695, %v331_v31 }
 0x198   : > { %v334_v35 = vmul.f32 1.442695, %v329_v33 }
 0x19a   : > { %658 = vpow2.f32 %v334_v35 }
 0x19b   : > { %660 = vpow2.f32 %v338_v34 }
 0x1a0   : > { %v655_v36 = vpop.eup %654 }
 0x1a1   : > { %v340_v37 = vsel %vm315_vm0, %v655_v36, 0.0  ;;  %v657_v38 = vpop.eup %656 }
 0x1a2   : > { %341 = vadd.xlane.f32.xlu0 %v340_v37  ;;  %v346_v40 = vsel %vm315_vm0, %v657_v38, 0.0 }
 0x1a4   : > { %v659_v39 = vpop.eup %658 }
 0x1a5   : > { %v343_v41 = vsel %vm315_vm0, %v659_v39, 0.0  ;;  %v661_v42 = vpop.eup %660 }
 0x1a6   : > { %347 = vadd.xlane.f32.xlu0 %v346_v40  ;;  %344 = vadd.xlane.f32.xlu1 %v343_v41  ;;  %v349_v43 = vsel %vm315_vm0, %v661_v42, 0.0 }
 0x1aa   : > { %350 = vadd.xlane.f32.xlu1 %v349_v43 }
 0x22f   : > { %v342_v50 = vpop.xlane.xlu0 %341 }
 0x230   : > { %662 = vrcp.f32 %v342_v50 }
 0x233   : > { %v345_v51 = vpop.xlane.xlu1 %344  ;;  %v348_v52 = vpop.xlane.xlu0 %347 }
 0x234   : > { %664 = vrcp.f32 %v345_v51 }
 0x235   : > { %666 = vrcp.f32 %v348_v52 }
 0x237   : > { %v351_v53 = vpop.xlane.xlu1 %350 }
 0x238   : > { %668 = vrcp.f32 %v351_v53 }
 0x23a   : > { %v663_v54 = vpop.eup %662 }
 0x23b   : > { %v353_v55 = vmul.f32 %v663_v54, %v655_v36 }
 0x23d   : > { %360 = vst.msk [vmem:[%s228_s14] sm:$0xff] %vm315_vm0, %v353_v55 }
 0x23e   : > { %v665_v56 = vpop.eup %664 }
 0x23f   : > { %v667_v57 = vpop.eup %666  ;;  %v355_v58 = vmul.f32 %v665_v56, %v659_v39 }
 0x240   : > { %v357_v59 = vmul.f32 %v667_v57, %v657_v38 }
 0x241   : > { %361 = vst.msk [vmem:[%s228_s14 + $0x8] sm:$0xff] %vm315_vm0, %v355_v58  ;;  %v364_v60 = vpack.c.bf16 %v355_v58, %v353_v55 }
 0x242   : > { %v669_v61 = vpop.eup %668  ;;  %362 = vst.msk [vmem:[%s228_s14 + $0x10] sm:$0xff] %vm315_vm0, %v357_v59 }
 0x243   : > { %609 = vmatprep.mubr.msk.bf16.mxu1 %vm315_vm0, %v364_v60  ;;  %v359_v62 = vmul.f32 %v669_v61, %v661_v42 }
 0x245   : > { %363 = vst.msk [vmem:[%s228_s14 + $0x18] sm:$0xff] %vm315_vm0, %v359_v62  ;;  %v365_v63 = vpack.c.bf16 %v359_v62, %v357_v59 }
 0x247   : > { %610 = vmatmul.mubr.msk.bf16.vlgmr.msra.gmra.mrb[0].mxu1 %vm315_vm0, %v365_v63 }
 0x248   : > { %683 = shalt.err (!%p680_p3)
}
 0x249   : > { %s684_s8 = scalar_lea.hbm %s845_s29, 512  ;;  %s688_s11 = scalar_lea.hbm %s898_s4, 1024 }
 0x24a   : > { %p685_p4 = scmp.ne.s32.totalorder %s845_s29, %s684_s8  ;;  %p689_p9 = scmp.lt.u32.totalorder %s845_s29, %s898_s4 }
 0x24b   : > { %p690_p10 = scmp.lt.u32.totalorder %s688_s11, %s684_s8  ;;  %p692_p12 = scmp.lt.u32.totalorder %s684_s8, %s845_s29 }
 0x24c   : > { %p686_p7 = pnand %p685_p4, %p800_p5 }
 0x24d   : > { %p691_p11 = por %p690_p10, %p689_p9 }
 0x24e   : > { %p687_p8 = pneg %p686_p7 }
 0x24f   : > { %p693_p13 = por %p692_p12, %p691_p11 }
 0x251   : > { %p694_p0 = pnand %p693_p13, %p687_p8 }
 0x253   : > { %697 = shalt.err (!%p694_p0)
}
 0x254   : > { %s735_s14 = smov 128   ;;  %s736_s20 = smov 8  }
 0x255   : > { %613 = dma.vmem_to_hbm [thread:$0]  (%p800_p5), %s847_s22, 512, %s845_s29, %s849_s30, %s735_s14, %s735_s14, %s736_s20  }
 0x256   : > { %s248_s5 = scalar_lea.vmem %s897_s3, %s812_s28 }
 0x31a   : > { %v611_v0 = vpop.f32.mrb[0].mxu1 }
 0x31b   : > { %429 = vst [vmem:[%s248_s5 + $0x10] sm:$0xff] %v611_v0  ;;  %v412_v1 = vpop.f32.mrb[1].mxu1 }
 0x31c   : > { %427 = vst [vmem:[%s248_s5] sm:$0xff] %v412_v1  ;;  %v612_v2 = vpop.f32.mrb[2].mxu1 }
 0x31d   : > { %430 = vst [vmem:[%s248_s5 + $0x18] sm:$0xff] %v612_v2  ;;  %v415_v3 = vpop.f32.mrb[3].mxu1 }
 0x31e   : > { %428 = vst [vmem:[%s248_s5 + $0x8] sm:$0xff] %v415_v3 }
 0x31f PF: > { %p619_p1 = scmp.ge.s32.totalorder %s732_s18, 2  ;;  %s476_s6 = sand.u32 1, %s720_s15  }
 0x320   : > { %s477_s25 = scalar_lea.sflag [#allocation3], %s476_s6 }
 0x321   : > { %p616_p5 = pnand %p619_p1, %p804_p6 }
 0x323   : > { %715 = dma.done.wait (!%p616_p5), %s477_s25, 512  }
 0x324   : > { %717 = vsyncadd (!%p616_p5), %s477_s25, 4294966784  ;;  %p15_p2 = scmp.ge.s32.totalorder %s787_s21, 4   ;;  %s901_s15 = smov %s724_s16 }
 0x325   : > { %s902_s16 = smov %s728_s17  ;;  %s903_s17 = smov %s798_s24 }
 0x326   : > { %s904_s18 = smov %s787_s21  ;;  %17 = sbr.rel (!%p15_p2) target bundleno = 3 (0x3), region = 85 }
 0x32d   :  { %482 = vsyncpa [#allocation3], 1 }
 0x32e   :  { %484 = vsyncpa [#allocation3 + $0x1], 1 }

// kernel: _lambda_.2
= control target key start
LH: loop header
LB: loop body
LE: loop exit
PB: predicated region body
PF: predicated region fallthrough
CT: control target
= control target key end

     0   :  { %v358_v1 = vmov 0   ;;  %vm120_vm0 = vcmask 392192   ;;  %v37_v14 = vlaneseq  ;;  %s521_s1 = inlined_call_operand.vmem [shape: bf16[48,384], index: 1, kind: input, shape index: {}]   ;;  %s522_s0 = inlined_call_operand.vmem [shape: bf16[64,48], index: 0, kind: input, shape index: {}]   ;;  %s523_s2 = inlined_call_operand.vmem [shape: f32[1,384], index: 2, kind: input, shape index: {}]   ;;  %s524_s3 = inlined_call_operand.vmem [shape: f32[64,384], index: 3, kind: output, shape index: {}]  }
   0x1   :  { %v342_v0 = vld [vmem:[%s521_s1 + $0x4] ss:$12 sps:$4 sm:$0xff]   ;;  %165 = vmatprep.mubr.bf16.mxu0 %v358_v1  ;;  %v344_v2 = vld [vmem:[%s521_s1] ss:$12 sps:$4 sm:$0xff]   ;;  %v345_v3 = vld [vmem:[%s521_s1 + $0x1c] ss:$12 sps:$4 sm:$0xff]  }
   0x2   :  { %133 = vmatprep.subr.bf16.mxu0 %v342_v0  ;;  %v347_v4 = vld [vmem:[%s521_s1 + $0x18] ss:$12 sps:$4 sm:$0xff]   ;;  %v348_v5 = vld [vmem:[%s521_s1 + $0x34] ss:$12 sps:$4 sm:$0xff]   ;;  %v350_v9 = vld [vmem:[%s521_s1 + $0x30] ss:$12 sps:$4 sm:$0xff]  }
   0x3   :  { %134 = vmatpush1.bf16.msra.mxu0 %v344_v2  ;;  %v351_v6 = vld [vmem:[%s522_s0] sm:$0xff]   ;;  %v352_v7 = vld [vmem:[%s521_s1 + $0x8] ss:$12 sps:$4 sm:$0xff]   ;;  %v357_v13 = vld [vmem:[%s522_s0 + $0x18] sm:$0xff]   ;;  %v38_v15 = vshrl.u32 %v37_v14, 7 }
   0x4   :  { %135 = vmatprep.subr.bf16.mxu0 %v345_v3  ;;  %v353_v8 = vld [vmem:[%s521_s1 + $0x20] ss:$12 sps:$4 sm:$0xff]   ;;  %333 = vmatprep.mubr.msk.bf16.mxu1 %vm120_vm0, %v351_v6  ;;  %v355_v10 = vld [vmem:[%s521_s1 + $0x38] ss:$12 sps:$4 sm:$0xff]   ;;  %v356_v12 = vld [vmem:[%s522_s0 + $0x10] sm:$0xff]  }
   0x5   :  { %327 = vmatprep.subr.bf16.mxu1 %v352_v7  ;;  %v354_v11 = vld [vmem:[%s522_s0 + $0x8] sm:$0xff]   ;;  %v39_v16 = vsub.s32 0, %v38_v15  ;;  %v35_v17 = vld [vmem:[%s523_s2] sm:$0x7]  ;;  %v43_v18 = vsub.s32 1, %v38_v15  ;;  %v47_v21 = vsub.s32 2, %v38_v15 }
   0x6   :  { %328 = vmatpush3.bf16.msra.mxu1 %v352_v7 }
   0x7   :  { %136 = vmatpush1.bf16.msra.mxu0 %v347_v4  ;;  %329 = vmatprep.subr.bf16.mxu1 %v353_v8  ;;  %v429_v19 = vrot.slane %v35_v17, %v39_v16  ;;  %v431_v20 = vrot.slane %v35_v17, %v43_v18  ;;  %v48_v27 = vrot.slane %v35_v17, %v47_v21 }
   0x8   :  { %137 = vmatprep.subr.bf16.mxu0 %v348_v5 }
   0xa   :  { %330 = vmatpush3.bf16.msra.mxu1 %v353_v8 }
   0xb   :  { %138 = vmatpush1.bf16.msra.mxu0 %v350_v9  ;;  %331 = vmatprep.subr.bf16.mxu1 %v355_v10 }
   0xe   :  { %312 = vmatmul.mubr.msk.bf16.vlgmr.msra.gmra.mrb[0].mxu0 %vm120_vm0, %v351_v6  ;;  %332 = vmatpush3.bf16.msra.mxu1 %v355_v10 }
   0xf   :  { %175 = vmatprep.mubr.bf16.mxu0 %v358_v1 }
  0x11   :  { %334 = vmatmul.mubr.msk.bf16.vlgmr.msra.gmra.mrb[0].mxu1 %vm120_vm0, %v354_v11 }
  0x12   :  { %337 = vmatprep.mubr.msk.bf16.mxu1 %vm120_vm0, %v356_v12 }
  0x16   :  { %313 = vmatmul.mubr.msk.bf16.gmra.mrb[4].mxu0 %vm120_vm0, %v354_v11 }
  0x17   :  { %185 = vmatprep.mubr.bf16.mxu0 %v358_v1 }
  0x19   :  { %338 = vmatmul.mubr.msk.bf16.gmra.mrb[4].mxu1 %vm120_vm0, %v357_v13 }
  0x1e   :  { %314 = vmatmul.mubr.msk.bf16.gmra.mrb[8].mxu0 %vm120_vm0, %v356_v12 }
  0x1f   :  { %195 = vmatprep.mubr.bf16.mxu0 %v358_v1 }
  0x26   :  { %315 = vmatmul.mubr.msk.bf16.gmra.mrb[12].mxu0 %vm120_vm0, %v357_v13 }
  0xe1   :  { %v167_v22 = vpop.f32.mrb[0].mxu0 }
  0xe2   :  { %v168_v23 = vadd.f32 %v167_v22, %v429_v19  ;;  %v169_v24 = vpop.f32.mrb[1].mxu0 }
  0xe3   :  { %v170_v25 = vadd.f32 %v169_v24, %v431_v20  ;;  %v171_v26 = vpop.f32.mrb[2].mxu0 }
  0xe4   :  { %271 = vst [vmem:[%s524_s3] sm:$0xff] %v168_v23  ;;  %v172_v28 = vadd.f32 %v171_v26, %v429_v19  ;;  %v173_v29 = vpop.f32.mrb[3].mxu0  ;;  %v335_v31 = vpop.f32.mrb[0].mxu1 }
  0xe5   :  { %272 = vst [vmem:[%s524_s3 + $0x8] sm:$0xff] %v170_v25  ;;  %v174_v30 = vadd.f32 %v173_v29, %v431_v20  ;;  %v249_v32 = vadd.f32 %v335_v31, %v48_v27  ;;  %v240_v33 = vpop.f32.mrb[1].mxu1 }
  0xe6   :  { %274 = vst [vmem:[%s524_s3 + $0x18] sm:$0xff] %v172_v28  ;;  %v241_v34 = vadd.f32 %v240_v33, %v48_v27  ;;  %v336_v35 = vpop.f32.mrb[2].mxu1 }
  0xe7   :  { %275 = vst [vmem:[%s524_s3 + $0x20] sm:$0xff] %v174_v30  ;;  %279 = vst [vmem:[%s524_s3 + $0x40] sm:$0xff] %v249_v32  ;;  %v252_v37 = vadd.f32 %v336_v35, %v48_v27  ;;  %v243_v38 = vpop.f32.mrb[3].mxu1 }
  0xe8   :  { %273 = vst [vmem:[%s524_s3 + $0x10] sm:$0xff] %v241_v34  ;;  %v244_v41 = vadd.f32 %v243_v38, %v48_v27 }
  0xe9   :  { %v177_v36 = vpop.f32.mrb[4].mxu0  ;;  %282 = vst [vmem:[%s524_s3 + $0x58] sm:$0xff] %v252_v37 }
  0xea   :  { %v178_v39 = vadd.f32 %v177_v36, %v429_v19  ;;  %v179_v40 = vpop.f32.mrb[5].mxu0  ;;  %276 = vst [vmem:[%s524_s3 + $0x28] sm:$0xff] %v244_v41 }
  0xeb   :  { %v180_v42 = vadd.f32 %v179_v40, %v431_v20  ;;  %v181_v43 = vpop.f32.mrb[6].mxu0 }
  0xec   :  { %277 = vst [vmem:[%s524_s3 + $0x30] sm:$0xff] %v178_v39  ;;  %v182_v44 = vadd.f32 %v181_v43, %v429_v19  ;;  %v183_v45 = vpop.f32.mrb[7].mxu0  ;;  %v339_v47 = vpop.f32.mrb[4].mxu1 }
  0xed   :  { %278 = vst [vmem:[%s524_s3 + $0x38] sm:$0xff] %v180_v42  ;;  %v184_v46 = vadd.f32 %v183_v45, %v431_v20  ;;  %v265_v48 = vadd.f32 %v339_v47, %v48_v27  ;;  %v256_v49 = vpop.f32.mrb[5].mxu1 }
  0xee   :  { %280 = vst [vmem:[%s524_s3 + $0x48] sm:$0xff] %v182_v44  ;;  %v257_v50 = vadd.f32 %v256_v49, %v48_v27  ;;  %v340_v51 = vpop.f32.mrb[6].mxu1 }
  0xef   :  { %281 = vst [vmem:[%s524_s3 + $0x50] sm:$0xff] %v184_v46  ;;  %291 = vst [vmem:[%s524_s3 + $0xa0] sm:$0xff] %v265_v48  ;;  %v268_v53 = vadd.f32 %v340_v51, %v48_v27  ;;  %v259_v54 = vpop.f32.mrb[7].mxu1 }
  0xf0   :  { %285 = vst [vmem:[%s524_s3 + $0x70] sm:$0xff] %v257_v50  ;;  %v260_v57 = vadd.f32 %v259_v54, %v48_v27 }
  0xf1   :  { %v187_v52 = vpop.f32.mrb[8].mxu0  ;;  %294 = vst [vmem:[%s524_s3 + $0xb8] sm:$0xff] %v268_v53 }
  0xf2   :  { %v188_v55 = vadd.f32 %v187_v52, %v429_v19  ;;  %v189_v56 = vpop.f32.mrb[9].mxu0  ;;  %288 = vst [vmem:[%s524_s3 + $0x88] sm:$0xff] %v260_v57 }
  0xf3   :  { %v190_v58 = vadd.f32 %v189_v56, %v431_v20  ;;  %v191_v59 = vpop.f32.mrb[10].mxu0 }
  0xf4   :  { %283 = vst [vmem:[%s524_s3 + $0x60] sm:$0xff] %v188_v55  ;;  %v192_v60 = vadd.f32 %v191_v59, %v429_v19  ;;  %v193_v61 = vpop.f32.mrb[11].mxu0 }
  0xf5   :  { %284 = vst [vmem:[%s524_s3 + $0x68] sm:$0xff] %v190_v58  ;;  %v194_v62 = vadd.f32 %v193_v61, %v431_v20 }
  0xf6   :  { %286 = vst [vmem:[%s524_s3 + $0x78] sm:$0xff] %v192_v60 }
  0xf7   :  { %287 = vst [vmem:[%s524_s3 + $0x80] sm:$0xff] %v194_v62 }
  0xf9   :  { %v197_v63 = vpop.f32.mrb[12].mxu0 }
  0xfa   :  { %v198_v0 = vadd.f32 %v197_v63, %v429_v19  ;;  %v199_v1 = vpop.f32.mrb[13].mxu0 }
  0xfb   :  { %v200_v2 = vadd.f32 %v199_v1, %v431_v20  ;;  %v201_v3 = vpop.f32.mrb[14].mxu0 }
  0xfc   :  { %289 = vst [vmem:[%s524_s3 + $0x90] sm:$0xff] %v198_v0  ;;  %v202_v4 = vadd.f32 %v201_v3, %v429_v19  ;;  %v203_v5 = vpop.f32.mrb[15].mxu0 }
  0xfd   :  { %290 = vst [vmem:[%s524_s3 + $0x98] sm:$0xff] %v200_v2  ;;  %v204_v6 = vadd.f32 %v203_v5, %v431_v20 }
  0xfe   :  { %292 = vst [vmem:[%s524_s3 + $0xa8] sm:$0xff] %v202_v4 }
  0xff   :  { %293 = vst [vmem:[%s524_s3 + $0xb0] sm:$0xff] %v204_v6 }

</bundles_post_ra>
